<compile_context>
chip_gen: v7x
topology: tpu7x:2x2x1
jax: 0.10.0
libtpu: 0.0.40
codegen_flags: <defaults>
</compile_context>

<pallas_src>
import functools

import jax
import jax.numpy as jnp
from jax.experimental import pallas as pl
from jax.experimental.pallas import tpu as pltpu


def _round_up(x, m):
    return (x + m - 1) // m * m


def _pad_feature(d):
    """Lane-dense padding: prefer 256-lane multiples (v6e/v7x MXU width) when cheap."""
    p128 = _round_up(d, 128)
    p256 = _round_up(d, 256)
    return p256 if (p256 - p128) * 8 <= p128 else p128


def _vmem_budget_bytes():
    """~80% of physical VMEM (v5e/v6e: 128 MiB, v7x: 64 MiB); leaves compiler headroom."""
    cap = 64 * 1024 * 1024  # conservative fallback = v7x physical VMEM
    try:
        info = pltpu.get_tpu_info()
        c = getattr(info, "vmem_capacity_bytes", None)
        if c:
            cap = int(c)
    except Exception:
        pass
    return (cap * 4) // 5


def _spec(shape, index_map, buffers=None):
    """BlockSpec with an optional explicit buffer count (falls back if unsupported)."""
    if buffers is None:
        return pl.BlockSpec(shape, index_map)
    try:
        return pl.BlockSpec(shape, index_map, pipeline_mode=pl.Buffered(buffers))
    except (TypeError, AttributeError):  # older jax: keep default double-buffering
        return pl.BlockSpec(shape, index_map)


def _gelu(h, approximate):
    if approximate:
        # tanh GELU lowers to the EUP slot (hidden behind MXU work); small numerics
        # delta vs torch.nn.GELU() default.
        return jax.nn.gelu(h, approximate=True)
    # exact GELU (matches torch.nn.GELU() default): 0.5*x*(1+erf(x/sqrt(2)))
    return 0.5 * h * (1.0 + jax.lax.erf(h * 0.7071067811865476))


def _mlp_kernel_resident(x_ref, w1_ref, b1_ref, w2_ref, b2_ref, o_ref, *, approximate_gelu):
    # x_ref: (tm, D_in_p); w1_ref: (D_in_p, H_p); b1_ref: (1, H_p) f32;
    # w2_ref: (H_p, D_out_p); b2_ref: (1, D_out_p) f32; o_ref: (tm, D_out_p)
    # fc1: both MXU operands in the weight dtype (bf16 path for bf16 weights), f32 acc.
    h = jnp.dot(x_ref[...].astype(w1_ref.dtype), w1_ref[...],
                preferred_element_type=jnp.float32)
    h = h + b1_ref[...]
    h = _gelu(h, approximate_gelu)
    # dropout(p=0) == identity
    y = jnp.dot(h.astype(w2_ref.dtype), w2_ref[...],
                preferred_element_type=jnp.float32)
    y = y + b2_ref[...]
    # dropout(p=0) == identity
    o_ref[...] = y.astype(o_ref.dtype)


def _mlp_kernel_htiled(x_ref, w1_ref, b1_ref, w2_ref, b2_ref, o_ref, acc_ref,
                       *, approximate_gelu):
    # Grid: (row tiles, H tiles).  w1 tiled (D_in_p, th), w2 tiled (th, D_out_p),
    # partial fc2 products accumulated into an f32 VMEM scratch per row tile.
    j = pl.program_id(1)

    @pl.when(j == 0)
    def _():
        acc_ref[...] = jnp.zeros_like(acc_ref)

    h = jnp.dot(x_ref[...].astype(w1_ref.dtype), w1_ref[...],
                preferred_element_type=jnp.float32)
    h = h + b1_ref[...]
    h = _gelu(h, approximate_gelu)
    acc_ref[...] += jnp.dot(h.astype(w2_ref.dtype), w2_ref[...],
                            preferred_element_type=jnp.float32)

    @pl.when(j == pl.num_programs(1) - 1)
    def _():
        o_ref[...] = (acc_ref[...] + b2_ref[...]).astype(o_ref.dtype)


def _pick_h_tiling(tm, d_in_p, d_out_p, hid_p, w_isz, x_isz, budget):
    """Largest (tm, th) whose H-tiled footprint fits the VMEM budget."""
    for tm_try in sorted({min(tm, 512), min(tm, 256), min(tm, 128)}, reverse=True):
        for th in (2048, 1024, 512, 256, 128):
            if th > _round_up(hid_p, 128):
                continue
            need = (2 * (d_in_p + d_out_p) * th * w_isz      # double-buffered w1/w2 tiles
                    + (2 * th + d_out_p) * 4                 # b1 tiles (dbl) + b2 (f32)
                    + 2 * tm_try * d_in_p * x_isz             # x tiles
                    + 2 * tm_try * d_out_p * x_isz            # out tiles
                    + tm_try * d_out_p * 4                    # f32 accumulator scratch
                    + tm_try * th * 4)                        # f32 h tile
            if need <= budget:
                return tm_try, th
    return min(tm, 128), 128  # last resort (very large D_in/D_out)


@functools.partial(jax.jit,
                   static_argnames=("tm", "approximate_gelu", "force_htile", "hidden_tile"))
def mlp_pallas(x, w1, b1, w2, b2, *, tm=None, approximate_gelu=False,
               force_htile=False, hidden_tile=None):
    """x: (..., D_in); w1: (D_in, H); b1: (H,); w2: (H, D_out); b2: (D_out,)."""
    orig_shape = x.shape
    d_in = orig_shape[-1]
    hid = w1.shape[1]
    d_out = w2.shape[1]
    assert w1.shape[0] == d_in and w2.shape[0] == hid
    assert b1.shape == (hid,) and b2.shape == (d_out,)

    x2d = x.reshape(-1, d_in)
    m = x2d.shape[0]

    # Lane-dense feature dims (padding is mathematically exact for this MLP).
    d_in_p = _round_up(d_in, 128)
    hid_p = _pad_feature(hid)
    d_out_p = _pad_feature(d_out)

    # Row tile: large (amortizes ~0.35us/grid-step), but with >=2 grid steps when
    # possible so both v7x TensorCores get work. No wrapper-side row padding:
    # Pallas masks the partial last row block (rows are independent).
    if tm is None:
        tm = min(512, _round_up(m, 128))
        if m > 256 and pl.cdiv(m, tm) < 2:
            tm = _round_up(pl.cdiv(m, 2), 128)

    w_isz = jnp.dtype(w1.dtype).itemsize
    x_isz = jnp.dtype(x.dtype).itemsize
    budget = _vmem_budget_bytes()

    # Footprint of the weight-resident variant (single-buffered weight slabs).
    resident_need = ((d_in_p * hid_p + hid_p * d_out_p) * w_isz
                     + (hid_p + d_out_p) * 4
                     + 2 * tm * d_in_p * x_isz
                     + 2 * tm * d_out_p * x_isz
                     + tm * hid_p * 4
                     + tm * d_out_p * 4)

    use_htile = bool(force_htile) or resident_need > budget

    if use_htile:
        if hidden_tile is not None:
            assert hidden_tile % 128 == 0, "hidden_tile must be a multiple of 128"
            tm_k, th = tm, hidden_tile
        else:
            tm_k, th = _pick_h_tiling(tm, d_in_p, d_out_p, hid_p, w_isz, x_isz, budget)
        hid_pad = _round_up(hid_p, th)
    else:
        tm_k, th = tm, None
        hid_pad = hid_p

    def pad2(a, rows, cols):
        pr, pc = rows - a.shape[0], cols - a.shape[1]
        return a if (pr == 0 and pc == 0) else jnp.pad(a, ((0, pr), (0, pc)))

    x_p = pad2(x2d, m, d_in_p)                     # column (K) padding only
    w1_p = pad2(w1, d_in_p, hid_pad)
    w2_p = pad2(w2, hid_pad, d_out_p)
    b1_p = jnp.pad(b1, (0, hid_pad - hid)).astype(jnp.float32).reshape(1, hid_pad)
    b2_p = jnp.pad(b2, (0, d_out_p - d_out)).astype(jnp.float32).reshape(1, d_out_p)

    if use_htile:
        grid = (pl.cdiv(m, tm_k), hid_pad // th)
        in_specs = [
            _spec((tm_k, d_in_p), lambda i, j: (i, 0)),
            _spec((d_in_p, th), lambda i, j: (0, j)),
            _spec((1, th), lambda i, j: (0, j)),
            _spec((th, d_out_p), lambda i, j: (j, 0)),
            _spec((1, d_out_p), lambda i, j: (0, 0), buffers=1),
        ]
        out_specs = pl.BlockSpec((tm_k, d_out_p), lambda i, j: (i, 0))
        scratch_shapes = (pltpu.VMEM((tm_k, d_out_p), jnp.float32),)
        kernel = functools.partial(_mlp_kernel_htiled, approximate_gelu=approximate_gelu)
        dims = ("parallel", "arbitrary")
    else:
        grid = (pl.cdiv(m, tm_k),)
        in_specs = [
            _spec((tm_k, d_in_p), lambda i: (i, 0)),
            _spec((d_in_p, hid_pad), lambda i: (0, 0), buffers=1),   # resident weights
            _spec((1, hid_pad), lambda i: (0, 0), buffers=1),
            _spec((hid_pad, d_out_p), lambda i: (0, 0), buffers=1),  # resident weights
            _spec((1, d_out_p), lambda i: (0, 0), buffers=1),
        ]
        out_specs = pl.BlockSpec((tm_k, d_out_p), lambda i: (i, 0))
        scratch_shapes = ()
        kernel = functools.partial(_mlp_kernel_resident, approximate_gelu=approximate_gelu)
        dims = ("parallel",)

    # Advisory cost estimate for XLA's scheduler.
    flops = 2 * m * (d_in_p * hid_pad + hid_pad * d_out_p)
    bytes_accessed = (x_p.size * x_p.dtype.itemsize
                      + w1_p.size * w1_p.dtype.itemsize + b1_p.size * 4
                      + w2_p.size * w2_p.dtype.itemsize + b2_p.size * 4
                      + m * d_out_p * x_isz)
    cost = pl.CostEstimate(flops=flops,
                           transcendentals=(m * hid_pad if approximate_gelu else 0),
                           bytes_accessed=bytes_accessed)

    out2d = pl.pallas_call(
        kernel,
        out_shape=jax.ShapeDtypeStruct((m, d_out_p), x.dtype),
        grid_spec=pltpu.PrefetchScalarGridSpec(
            num_scalar_prefetch=0,
            grid=grid,
            in_specs=in_specs,
            out_specs=out_specs,
            scratch_shapes=scratch_shapes),
        compiler_params=pltpu.CompilerParams(
            dimension_semantics=dims,
            vmem_limit_bytes=int(budget)),
        cost_estimate=cost,
    )(x_p, w1_p, b1_p, w2_p, b2_p)

    if d_out_p != d_out:
        out2d = out2d[:, :d_out]
    return out2d.reshape(*orig_shape[:-1], d_out)


def _init_linear(key, fan_in, fan_out, dtype=jnp.float32):
    """Deterministic init mimicking torch.nn.Linear defaults: U(-1/sqrt(fan_in), +)."""
    kw, kb = jax.random.split(key)
    bound = 1.0 / jnp.sqrt(jnp.float32(fan_in))
    # stored as (fan_in, fan_out) == W^T relative to PyTorch's (out, in)
    w = jax.random.uniform(kw, (fan_in, fan_out), dtype, -bound, bound)
    b = jax.random.uniform(kb, (fan_out,), dtype, -bound, bound)
    return w, b


def _mlp_reference(x, w1, b1, w2, b2):
    h = jnp.dot(x, w1) + b1
    h = 0.5 * h * (1.0 + jax.lax.erf(h * 0.7071067811865476))
    return jnp.dot(h, w2) + b2


if __name__ == "__main__":
    # Small shapes consistent with the module: batch=2, seq=8, in=32, hidden=64, out=32
    B, S = 2, 8
    IN_F, HID_F, OUT_F = 32, 64, 32

    key = jax.random.PRNGKey(0)
    kx, k1, k2, kx2, k3, k4, kx3 = jax.random.split(key, 7)

    x = jax.random.normal(kx, (B, S, IN_F), dtype=jnp.float32)
    w1, b1 = _init_linear(k1, IN_F, HID_F)
    w2, b2 = _init_linear(k2, HID_F, OUT_F)

    out = jax.block_until_ready(mlp_pallas(x, w1, b1, w2, b2))
    ref = _mlp_reference(x, w1, b1, w2, b2)
    assert out.shape == (B, S, OUT_F)
    assert jnp.allclose(out, ref, atol=1e-5, rtol=1e-5), "mismatch vs reference"

    # Ragged row count (15 rows) + explicit row tile: exercises the masked partial
    # last row block (wrapper-side row padding/slicing has been removed).
    x2 = jax.random.normal(kx2, (3, 5, IN_F), dtype=jnp.float32)
    out2 = jax.block_until_ready(mlp_pallas(x2, w1, b1, w2, b2, tm=256))
    ref2 = _mlp_reference(x2, w1, b1, w2, b2)
    assert out2.shape == (3, 5, OUT_F)
    assert jnp.allclose(out2, ref2, atol=1e-5, rtol=1e-5), "mismatch vs reference (ragged)"

    # Force the H-tiled (v7x / large-model) path: 3 reduction steps over the hidden
    # dim, 2 row tiles (one partial), accumulator init/finalize via pl.when, plus
    # column-padded D_in and sliced D_out.
    IN3, HID3, OUT3 = 48, 384, 96
    x3 = jax.random.normal(kx3, (2, 136, IN3), dtype=jnp.float32)
    w1b, b1b = _init_linear(k3, IN3, HID3)
    w2b, b2b = _init_linear(k4, HID3, OUT3)
    out3 = jax.block_until_ready(
        mlp_pallas(x3, w1b, b1b, w2b, b2b, force_htile=True, hidden_tile=128))
    ref3 = _mlp_reference(x3, w1b, b1b, w2b, b2b)
    assert out3.shape == (2, 136, OUT3)
    assert jnp.allclose(out3, ref3, atol=1e-4, rtol=1e-4), "mismatch vs reference (h-tiled)"

    print("KERNEL_OK")
</pallas_src>

<mosaic_0001>
module attributes {stable_mosaic.version = 11 : i64} {
  func.func @_mlp_kernel_resident(%arg0: i32, %arg1: memref<128x128xf32, #tpu.memory_space<vmem>>, %arg2: memref<128x128xf32, #tpu.memory_space<vmem>>, %arg3: memref<1x128xf32, #tpu.memory_space<vmem>>, %arg4: memref<128x128xf32, #tpu.memory_space<vmem>>, %arg5: memref<1x128xf32, #tpu.memory_space<vmem>>, %arg6: memref<128x128xf32, #tpu.memory_space<vmem>>) attributes {dimension_semantics = [#tpu.dimension_semantics<parallel>], iteration_bounds = array<i64: 1>, scalar_prefetch = 0 : i64, scratch_operands = 0 : i64, tpu.core_type = #tpu.core_type<tc>, window_params = [{transform_indices = @transform_0, window_bounds = array<i64: 128, 128>}, {pipeline_mode = #tpu.pipeline_mode<synchronous>, transform_indices = @transform_1, window_bounds = array<i64: 128, 128>}, {pipeline_mode = #tpu.pipeline_mode<synchronous>, transform_indices = @transform_2, window_bounds = array<i64: 1, 128>}, {pipeline_mode = #tpu.pipeline_mode<synchronous>, transform_indices = @transform_3, window_bounds = array<i64: 128, 128>}, {pipeline_mode = #tpu.pipeline_mode<synchronous>, transform_indices = @transform_4, window_bounds = array<i64: 1, 128>}, {transform_indices = @transform_5, window_bounds = array<i64: 128, 128>}]} {
    %c0 = arith.constant 0 : index
    %c0_0 = arith.constant 0 : index
    %0 = vector.load %arg1[%c0, %c0_0] : memref<128x128xf32, #tpu.memory_space<vmem>>, vector<128x128xf32>
    %c0_1 = arith.constant 0 : index
    %c0_2 = arith.constant 0 : index
    %1 = vector.load %arg2[%c0_1, %c0_2] : memref<128x128xf32, #tpu.memory_space<vmem>>, vector<128x128xf32>
    %cst = arith.constant dense<0.000000e+00> : vector<128x128xf32>
    %2 = tpu.matmul %0, %1, %cst {dimension_numbers = #tpu.dot_dimension_numbers<[1], [0], [0], [1], [0, 0, 1, 1], [], []>} : vector<128x128xf32>, vector<128x128xf32>, vector<128x128xf32> -> vector<128x128xf32>
    %c0_3 = arith.constant 0 : index
    %c0_4 = arith.constant 0 : index
    %3 = vector.load %arg3[%c0_3, %c0_4] : memref<1x128xf32, #tpu.memory_space<vmem>>, vector<1x128xf32>
    %4 = vector.broadcast %3 : vector<1x128xf32> to vector<128x128xf32>
    %5 = arith.addf %2, %4 : vector<128x128xf32>
    %cst_5 = arith.constant 5.000000e-01 : f32
    %6 = vector.broadcast %cst_5 : f32 to vector<128x128xf32>
    %7 = arith.mulf %6, %5 : vector<128x128xf32>
    %cst_6 = arith.constant 0.707106769 : f32
    %8 = vector.broadcast %cst_6 : f32 to vector<128x128xf32>
    %9 = arith.mulf %5, %8 : vector<128x128xf32>
    %10 = math.erf %9 : vector<128x128xf32>
    %cst_7 = arith.constant 1.000000e+00 : f32
    %11 = vector.broadcast %cst_7 : f32 to vector<128x128xf32>
    %12 = arith.addf %11, %10 : vector<128x128xf32>
    %13 = arith.mulf %7, %12 : vector<128x128xf32>
    %c0_8 = arith.constant 0 : index
    %c0_9 = arith.constant 0 : index
    %14 = vector.load %arg4[%c0_8, %c0_9] : memref<128x128xf32, #tpu.memory_space<vmem>>, vector<128x128xf32>
    %cst_10 = arith.constant dense<0.000000e+00> : vector<128x128xf32>
    %15 = tpu.matmul %13, %14, %cst_10 {dimension_numbers = #tpu.dot_dimension_numbers<[1], [0], [0], [1], [0, 0, 1, 1], [], []>} : vector<128x128xf32>, vector<128x128xf32>, vector<128x128xf32> -> vector<128x128xf32>
    %c0_11 = arith.constant 0 : index
    %c0_12 = arith.constant 0 : index
    %16 = vector.load %arg5[%c0_11, %c0_12] : memref<1x128xf32, #tpu.memory_space<vmem>>, vector<1x128xf32>
    %17 = vector.broadcast %16 : vector<1x128xf32> to vector<128x128xf32>
    %18 = arith.addf %15, %17 : vector<128x128xf32>
    %c0_13 = arith.constant 0 : index
    %c0_14 = arith.constant 0 : index
    %19 = vector.load %arg6[%c0_13, %c0_14] : memref<128x128xf32, #tpu.memory_space<vmem>>, vector<128x128xf32>
    tpu.vector_store %arg6[%c0_13, %c0_14], %18 {strides = array<i32>} : memref<128x128xf32, #tpu.memory_space<vmem>>, vector<128x128xf32>,
    return
  }
  func.func @transform_0(%arg0: i32) -> (i32, i32) {
    %c0_i32 = arith.constant 0 : i32
    %c0_i32_0 = arith.constant 0 : i32
    return %arg0, %c0_i32 : i32, i32
  }
  func.func @transform_1(%arg0: i32) -> (i32, i32) {
    %c0_i32 = arith.constant 0 : i32
    %c0_i32_0 = arith.constant 0 : i32
    %c0_i32_1 = arith.constant 0 : i32
    return %c0_i32, %c0_i32_0 : i32, i32
  }
  func.func @transform_2(%arg0: i32) -> (i32, i32) {
    %c0_i32 = arith.constant 0 : i32
    %c0_i32_0 = arith.constant 0 : i32
    %c0_i32_1 = arith.constant 0 : i32
    return %c0_i32, %c0_i32_0 : i32, i32
  }
  func.func @transform_3(%arg0: i32) -> (i32, i32) {
    %c0_i32 = arith.constant 0 : i32
    %c0_i32_0 = arith.constant 0 : i32
    %c0_i32_1 = arith.constant 0 : i32
    return %c0_i32, %c0_i32_0 : i32, i32
  }
  func.func @transform_4(%arg0: i32) -> (i32, i32) {
    %c0_i32 = arith.constant 0 : i32
    %c0_i32_0 = arith.constant 0 : i32
    %c0_i32_1 = arith.constant 0 : i32
    return %c0_i32, %c0_i32_0 : i32, i32
  }
  func.func @transform_5(%arg0: i32) -> (i32, i32) {
    %c0_i32 = arith.constant 0 : i32
    %c0_i32_0 = arith.constant 0 : i32
    return %arg0, %c0_i32 : i32, i32
  }
}

</mosaic_0001>

<bundles_post_ra>
// kernel: mlp_pallas.1
= control target key start
LH: loop header
LB: loop body
LE: loop exit
PB: predicated region body
PF: predicated region fallthrough
CT: control target
= control target key end

     0   :  { %s1002_s0 = inlined_call_operand.vmem [shape: f32[16,128], index: 0, kind: input, shape index: {}]   ;;  %s1003_s1 = inlined_call_operand.vmem [shape: f32[128,128], index: 1, kind: input, shape index: {}]   ;;  %s1004_s2 = inlined_call_operand.vmem [shape: f32[1,128], index: 2, kind: input, shape index: {}]   ;;  %s1005_s3 = inlined_call_operand.vmem [shape: f32[128,128], index: 3, kind: input, shape index: {}]   ;;  %s1006_s4 = inlined_call_operand.vmem [shape: f32[1,128], index: 4, kind: input, shape index: {}]   ;;  %s1007_s5 = inlined_call_operand.vmem [shape: f32[16,128], index: 5, kind: output, shape index: {}]  }
   0x1   :  { %v36_v0 = vld [vmem:[%s1003_s1] sm:$0xff]  ;;  %v37_v1 = vld [vmem:[%s1003_s1 + $0x8] sm:$0xff]  ;;  %v38_v2 = vld [vmem:[%s1003_s1 + $0x10] sm:$0xff] }
   0x2   :  { %v690_v3 = vpack.c.bf16 %v37_v1, %v36_v0  ;;  %v39_v4 = vld [vmem:[%s1003_s1 + $0x18] sm:$0xff]  ;;  %v40_v6 = vld [vmem:[%s1003_s1 + $0x20] sm:$0xff]  ;;  %v41_v7 = vld [vmem:[%s1003_s1 + $0x28] sm:$0xff] }
   0x3   :  { %v694_v5 = vpack.c.bf16 %v39_v4, %v38_v2  ;;  %v698_v8 = vpack.c.bf16 %v41_v7, %v40_v6  ;;  %v20_v9 = vld [vmem:[%s1002_s0] sm:$0xff]  ;;  %v42_v10 = vld [vmem:[%s1003_s1 + $0x30] sm:$0xff]  ;;  %v43_v11 = vld [vmem:[%s1003_s1 + $0x38] sm:$0xff] }
   0x4   :  { %691 = vmatprep.subr.bf16.mxu0 %v690_v3  ;;  %610 = vmatprep.mubr.f32.mxu0 %v20_v9  ;;  %v702_v12 = vpack.c.bf16 %v43_v11, %v42_v10  ;;  %v44_v13 = vld [vmem:[%s1003_s1 + $0x40] sm:$0xff]  ;;  %v45_v14 = vld [vmem:[%s1003_s1 + $0x48] sm:$0xff]  ;;  %v286_v17 = vld [vmem:[%s1005_s3 + $0x10] sm:$0xff] }
   0x5   :  { %693 = vmatpush3.bf16.msra.mxu0 %v690_v3  ;;  %v284_v15 = vld [vmem:[%s1005_s3] sm:$0xff]  ;;  %v285_v16 = vld [vmem:[%s1005_s3 + $0x8] sm:$0xff]  ;;  %v287_v18 = vld [vmem:[%s1005_s3 + $0x18] sm:$0xff]  ;;  %v706_v21 = vpack.c.bf16 %v45_v14, %v44_v13 }
   0x6   :  { %695 = vmatprep.subr.bf16.mxu0 %v694_v5  ;;  %v722_v19 = vpack.c.bf16 %v285_v16, %v284_v15  ;;  %v726_v20 = vpack.c.bf16 %v287_v18, %v286_v17  ;;  %v288_v22 = vld [vmem:[%s1005_s3 + $0x20] sm:$0xff]  ;;  %v289_v23 = vld [vmem:[%s1005_s3 + $0x28] sm:$0xff]  ;;  %v46_v24 = vld [vmem:[%s1003_s1 + $0x50] sm:$0xff] }
   0x7   :  { %v47_v25 = vld [vmem:[%s1003_s1 + $0x58] sm:$0xff]  ;;  %v730_v26 = vpack.c.bf16 %v289_v23, %v288_v22  ;;  %v48_v28 = vld [vmem:[%s1003_s1 + $0x60] sm:$0xff]  ;;  %v49_v29 = vld [vmem:[%s1003_s1 + $0x68] sm:$0xff] }
   0x8   :  { %723 = vmatprep.subr.bf16.mxu1 %v722_v19  ;;  %v710_v27 = vpack.c.bf16 %v47_v25, %v46_v24  ;;  %v714_v30 = vpack.c.bf16 %v49_v29, %v48_v28  ;;  %v50_v31 = vld [vmem:[%s1003_s1 + $0x70] sm:$0xff]  ;;  %v51_v32 = vld [vmem:[%s1003_s1 + $0x78] sm:$0xff]  ;;  %v21_v34 = vld [vmem:[%s1002_s0 + $0x8] sm:$0xff] }
   0x9   :  { %697 = vmatpush3.bf16.msra.mxu0 %v694_v5  ;;  %725 = vmatpush3.bf16.msra.mxu1 %v722_v19  ;;  %v718_v33 = vpack.c.bf16 %v51_v32, %v50_v31  ;;  %v22_v35 = vld [vmem:[%s1002_s0 + $0x10] sm:$0xff]  ;;  %v23_v36 = vld [vmem:[%s1002_s0 + $0x18] sm:$0xff]  ;;  %v24_v37 = vld [vmem:[%s1002_s0 + $0x20] sm:$0xff] }
   0xa   :  { %699 = vmatprep.subr.bf16.mxu0 %v698_v8  ;;  %727 = vmatprep.subr.bf16.mxu1 %v726_v20  ;;  %v25_v38 = vld [vmem:[%s1002_s0 + $0x28] sm:$0xff]  ;;  %v26_v39 = vld [vmem:[%s1002_s0 + $0x30] sm:$0xff]  ;;  %v27_v40 = vld [vmem:[%s1002_s0 + $0x38] sm:$0xff] }
   0xb   :  { %v28_v41 = vld [vmem:[%s1002_s0 + $0x40] sm:$0xff]  ;;  %v29_v42 = vld [vmem:[%s1002_s0 + $0x48] sm:$0xff]  ;;  %v30_v43 = vld [vmem:[%s1002_s0 + $0x50] sm:$0xff] }
   0xc   :  { %v31_v44 = vld [vmem:[%s1002_s0 + $0x58] sm:$0xff]  ;;  %v32_v45 = vld [vmem:[%s1002_s0 + $0x60] sm:$0xff]  ;;  %v33_v46 = vld [vmem:[%s1002_s0 + $0x68] sm:$0xff] }
   0xd   :  { %701 = vmatpush3.bf16.msra.mxu0 %v698_v8  ;;  %729 = vmatpush3.bf16.msra.mxu1 %v726_v20  ;;  %v34_v47 = vld [vmem:[%s1002_s0 + $0x70] sm:$0xff]  ;;  %v35_v48 = vld [vmem:[%s1002_s0 + $0x78] sm:$0xff]  ;;  %v292_v52 = vld [vmem:[%s1005_s3 + $0x40] sm:$0xff] }
   0xe   :  { %703 = vmatprep.subr.bf16.mxu0 %v702_v12  ;;  %731 = vmatprep.subr.bf16.mxu1 %v730_v26  ;;  %v290_v49 = vld [vmem:[%s1005_s3 + $0x30] sm:$0xff]  ;;  %v291_v50 = vld [vmem:[%s1005_s3 + $0x38] sm:$0xff]  ;;  %v293_v53 = vld [vmem:[%s1005_s3 + $0x48] sm:$0xff] }
   0xf   :  { %v734_v51 = vpack.c.bf16 %v291_v50, %v290_v49  ;;  %v738_v54 = vpack.c.bf16 %v293_v53, %v292_v52  ;;  %v294_v55 = vld [vmem:[%s1005_s3 + $0x50] sm:$0xff]  ;;  %v295_v56 = vld [vmem:[%s1005_s3 + $0x58] sm:$0xff]  ;;  %v296_v58 = vld [vmem:[%s1005_s3 + $0x60] sm:$0xff] }
  0x10   :  { %v742_v57 = vpack.c.bf16 %v295_v56, %v294_v55  ;;  %v297_v59 = vld [vmem:[%s1005_s3 + $0x68] sm:$0xff]  ;;  %v298_v61 = vld [vmem:[%s1005_s3 + $0x70] sm:$0xff]  ;;  %v299_v62 = vld [vmem:[%s1005_s3 + $0x78] sm:$0xff] }
  0x11   :  { %705 = vmatpush3.bf16.msra.mxu0 %v702_v12  ;;  %733 = vmatpush3.bf16.msra.mxu1 %v730_v26  ;;  %v746_v60 = vpack.c.bf16 %v297_v59, %v296_v58  ;;  %v750_v63 = vpack.c.bf16 %v299_v62, %v298_v61  ;;  %v963_v0 = vld [vmem:[%s1004_s2] ss:$0 sm:$0xff] }
  0x12   :  { %707 = vmatprep.subr.bf16.mxu0 %v706_v21  ;;  %735 = vmatprep.subr.bf16.mxu1 %v734_v51 }
  0x15   :  { %709 = vmatpush3.bf16.msra.mxu0 %v706_v21  ;;  %737 = vmatpush3.bf16.msra.mxu1 %v734_v51 }
  0x16   :  { %711 = vmatprep.subr.bf16.mxu0 %v710_v27  ;;  %739 = vmatprep.subr.bf16.mxu1 %v738_v54 }
  0x19   :  { %713 = vmatpush3.bf16.msra.mxu0 %v710_v27  ;;  %741 = vmatpush3.bf16.msra.mxu1 %v738_v54 }
  0x1a   :  { %715 = vmatprep.subr.bf16.mxu0 %v714_v30  ;;  %743 = vmatprep.subr.bf16.mxu1 %v742_v57 }
  0x1d   :  { %717 = vmatpush3.bf16.msra.mxu0 %v714_v30  ;;  %745 = vmatpush3.bf16.msra.mxu1 %v742_v57 }
  0x1e   :  { %719 = vmatprep.subr.bf16.mxu0 %v718_v33  ;;  %747 = vmatprep.subr.bf16.mxu1 %v746_v60 }
  0x21   :  { %721 = vmatpush3.bf16.msra.mxu0 %v718_v33  ;;  %749 = vmatpush3.bf16.msra.mxu1 %v746_v60 }
  0x22   :  { %751 = vmatprep.subr.bf16.mxu1 %v750_v63 }
  0x24   :  { %611 = vmatmul.mubr.f32.vlgmr.msra.gmra.mrb[0].mxu0 %v21_v34 }
  0x25   :  { %613 = vmatprep.mubr.f32.mxu0 %v22_v35  ;;  %753 = vmatpush3.bf16.msra.mxu1 %v750_v63 }
  0x28   :  { %614 = vmatmul.mubr.f32.gmra.mrb[2].mxu0 %v23_v36 }
  0x29   :  { %616 = vmatprep.mubr.f32.mxu0 %v24_v37 }
  0x2c   :  { %617 = vmatmul.mubr.f32.gmra.mrb[4].mxu0 %v25_v38 }
  0x2d   :  { %619 = vmatprep.mubr.f32.mxu0 %v26_v39 }
  0x30   :  { %620 = vmatmul.mubr.f32.gmra.mrb[6].mxu0 %v27_v40 }
  0x31   :  { %622 = vmatprep.mubr.f32.mxu0 %v28_v41 }
  0x34   :  { %623 = vmatmul.mubr.f32.gmra.mrb[8].mxu0 %v29_v42 }
  0x35   :  { %625 = vmatprep.mubr.f32.mxu0 %v30_v43 }
  0x38   :  { %626 = vmatmul.mubr.f32.gmra.mrb[10].mxu0 %v31_v44 }
  0x39   :  { %628 = vmatprep.mubr.f32.mxu0 %v32_v45 }
  0x3c   :  { %629 = vmatmul.mubr.f32.gmra.mrb[12].mxu0 %v33_v46 }
  0x3d   :  { %631 = vmatprep.mubr.f32.mxu0 %v34_v47 }
  0x40   :  { %632 = vmatmul.mubr.f32.gmra.mrb[14].mxu0 %v35_v48 }
  0xf7   :  { %v612_v1 = vpop.f32.mrb[0].mxu0 }
  0xf8   :  { %v131_v2 = vadd.f32 %v612_v1, %v963_v0  ;;  %v125_v3 = vpop.f32.mrb[1].mxu0 }
  0xf9   :  { %v126_v4 = vadd.f32 %v963_v0, %v125_v3 }
  0xfa   :  { %v221_v5 = vmul.f32 0.70710677, %v131_v2  ;;  %v205_v33 = vmul.f32 0.5, %v131_v2 }
  0xfb   :  { %v220_v6 = vmul.f32 0.70710677, %v126_v4  ;;  %v615_v7 = vpop.f32.mrb[2].mxu0  ;;  %v204_v31 = vmul.f32 0.5, %v126_v4 }
  0xfc   :  { %754 = verf.f32 %v221_v5  ;;  %v141_v8 = vadd.f32 %v615_v7, %v963_v0  ;;  %v135_v9 = vpop.f32.mrb[3].mxu0 }
  0xfd   :  { %756 = verf.f32 %v220_v6  ;;  %v136_v10 = vadd.f32 %v963_v0, %v135_v9 }
  0xfe   :  { %v223_v11 = vmul.f32 0.70710677, %v141_v8  ;;  %v207_v47 = vmul.f32 0.5, %v141_v8 }
  0xff   :  { %v222_v12 = vmul.f32 0.70710677, %v136_v10  ;;  %v618_v13 = vpop.f32.mrb[4].mxu0  ;;  %v206_v43 = vmul.f32 0.5, %v136_v10 }
 0x100   :  { %758 = verf.f32 %v223_v11  ;;  %v151_v14 = vadd.f32 %v618_v13, %v963_v0  ;;  %v145_v15 = vpop.f32.mrb[5].mxu0 }
 0x101   :  { %760 = verf.f32 %v222_v12  ;;  %v146_v16 = vadd.f32 %v963_v0, %v145_v15 }
 0x102   :  { %v225_v17 = vmul.f32 0.70710677, %v151_v14  ;;  %v209_v61 = vmul.f32 0.5, %v151_v14 }
 0x103   :  { %v224_v18 = vmul.f32 0.70710677, %v146_v16  ;;  %v621_v19 = vpop.f32.mrb[6].mxu0  ;;  %v208_v57 = vmul.f32 0.5, %v146_v16 }
 0x104   :  { %762 = verf.f32 %v225_v17  ;;  %v972_v20 = vadd.f32 %v621_v19, %v963_v0  ;;  %v155_v21 = vpop.f32.mrb[7].mxu0 }
 0x105   :  { %764 = verf.f32 %v224_v18  ;;  %v156_v22 = vadd.f32 %v963_v0, %v155_v21 }
 0x106   :  { %v755_v23 = vpop.eup %754  ;;  %v227_v24 = vmul.f32 0.70710677, %v972_v20  ;;  %v211_v12 = vmul.f32 0.5, %v972_v20 }
 0x107   :  { %v757_v25 = vpop.eup %756  ;;  %v253_v26 = vadd.f32 1.0, %v755_v23  ;;  %v226_v27 = vmul.f32 0.70710677, %v156_v22  ;;  %v624_v28 = vpop.f32.mrb[8].mxu0  ;;  %v210_v8 = vmul.f32 0.5, %v156_v22 }
 0x108   :  { %766 = verf.f32 %v227_v24  ;;  %v977_v29 = vadd.f32 %v624_v28, %v963_v0  ;;  %v165_v30 = vpop.f32.mrb[9].mxu0  ;;  %v252_v32 = vadd.f32 1.0, %v757_v25 }
 0x109   :  { %768 = verf.f32 %v226_v27  ;;  %v166_v34 = vadd.f32 %v963_v0, %v165_v30  ;;  %v269_v42 = vmul.f32 %v253_v26, %v205_v33 }
 0x10a   :  { %v759_v35 = vpop.eup %758  ;;  %v229_v36 = vmul.f32 0.70710677, %v977_v29  ;;  %v268_v37 = vmul.f32 %v252_v32, %v204_v31  ;;  %v213_v24 = vmul.f32 0.5, %v977_v29 }
 0x10b   :  { %v761_v38 = vpop.eup %760  ;;  %v255_v39 = vadd.f32 1.0, %v759_v35  ;;  %v228_v40 = vmul.f32 0.70710677, %v166_v34  ;;  %v627_v41 = vpop.f32.mrb[10].mxu0  ;;  %v212_v22 = vmul.f32 0.5, %v166_v34 }
 0x10c   :  { %v254_v44 = vadd.f32 1.0, %v761_v38  ;;  %770 = verf.f32 %v229_v36  ;;  %v982_v45 = vadd.f32 %v627_v41, %v963_v0  ;;  %v175_v46 = vpop.f32.mrb[11].mxu0  ;;  %666 = vmatprep.mubr.f32.mxu1 %v268_v37 }
 0x10d   :  { %772 = verf.f32 %v228_v40  ;;  %v176_v48 = vadd.f32 %v963_v0, %v175_v46  ;;  %667 = vmatmul.mubr.f32.vlgmr.msra.gmra.mrb[0].mxu1 %v269_v42  ;;  %v271_v56 = vmul.f32 %v255_v39, %v207_v47 }
 0x10e   :  { %v763_v49 = vpop.eup %762  ;;  %v231_v50 = vmul.f32 0.70710677, %v982_v45  ;;  %v270_v51 = vmul.f32 %v254_v44, %v206_v43  ;;  %v215_v31 = vmul.f32 0.5, %v982_v45 }
 0x10f   :  { %v765_v52 = vpop.eup %764  ;;  %v257_v53 = vadd.f32 1.0, %v763_v49  ;;  %v230_v54 = vmul.f32 0.70710677, %v176_v48  ;;  %v630_v55 = vpop.f32.mrb[12].mxu0  ;;  %v214_v28 = vmul.f32 0.5, %v176_v48 }
 0x110   :  { %v256_v58 = vadd.f32 1.0, %v765_v52  ;;  %774 = verf.f32 %v231_v50  ;;  %v191_v59 = vadd.f32 %v630_v55, %v963_v0  ;;  %v185_v60 = vpop.f32.mrb[13].mxu0  ;;  %669 = vmatprep.mubr.f32.mxu1 %v270_v51  ;;  %v513_v49 = vld [vmem:[%s1006_s4] ss:$0 sm:$0xff] }
 0x111   :  { %776 = verf.f32 %v230_v54  ;;  %v186_v62 = vadd.f32 %v963_v0, %v185_v60  ;;  %670 = vmatmul.mubr.f32.gmra.mrb[2].mxu1 %v271_v56  ;;  %v273_v7 = vmul.f32 %v257_v53, %v209_v61 }
 0x112   :  { %v767_v63 = vpop.eup %766  ;;  %v233_v1 = vmul.f32 0.70710677, %v191_v59  ;;  %v272_v2 = vmul.f32 %v256_v58, %v208_v57  ;;  %v217_v38 = vmul.f32 0.5, %v191_v59 }
 0x113   :  { %v769_v3 = vpop.eup %768  ;;  %v259_v4 = vadd.f32 1.0, %v767_v63  ;;  %v232_v5 = vmul.f32 0.70710677, %v186_v62  ;;  %v633_v6 = vpop.f32.mrb[14].mxu0  ;;  %v216_v37 = vmul.f32 0.5, %v186_v62 }
 0x114   :  { %v258_v9 = vadd.f32 1.0, %v769_v3  ;;  %778 = verf.f32 %v233_v1  ;;  %v201_v10 = vadd.f32 %v633_v6, %v963_v0  ;;  %v195_v11 = vpop.f32.mrb[15].mxu0  ;;  %672 = vmatprep.mubr.f32.mxu1 %v272_v2 }
 0x115   :  { %780 = verf.f32 %v232_v5  ;;  %v196_v13 = vadd.f32 %v963_v0, %v195_v11  ;;  %673 = vmatmul.mubr.f32.gmra.mrb[4].mxu1 %v273_v7  ;;  %v275_v21 = vmul.f32 %v259_v4, %v211_v12 }
 0x116   :  { %v771_v14 = vpop.eup %770  ;;  %v235_v15 = vmul.f32 0.70710677, %v201_v10  ;;  %v274_v16 = vmul.f32 %v258_v9, %v210_v8  ;;  %v219_v45 = vmul.f32 0.5, %v201_v10 }
 0x117   :  { %v773_v17 = vpop.eup %772  ;;  %v261_v18 = vadd.f32 1.0, %v771_v14  ;;  %v234_v19 = vmul.f32 0.70710677, %v196_v13  ;;  %v218_v44 = vmul.f32 0.5, %v196_v13 }
 0x118   :  { %v260_v23 = vadd.f32 1.0, %v773_v17  ;;  %782 = verf.f32 %v235_v15  ;;  %675 = vmatprep.mubr.f32.mxu1 %v274_v16 }
 0x119   :  { %784 = verf.f32 %v234_v19  ;;  %676 = vmatmul.mubr.f32.gmra.mrb[6].mxu1 %v275_v21  ;;  %v277_v27 = vmul.f32 %v261_v18, %v213_v24 }
 0x11a   :  { %v775_v20 = vpop.eup %774  ;;  %v276_v25 = vmul.f32 %v260_v23, %v212_v22 }
 0x11b   :  { %v777_v26 = vpop.eup %776  ;;  %v263_v0 = vadd.f32 1.0, %v775_v20 }
 0x11c   :  { %v262_v30 = vadd.f32 1.0, %v777_v26  ;;  %678 = vmatprep.mubr.f32.mxu1 %v276_v25 }
 0x11d   :  { %679 = vmatmul.mubr.f32.gmra.mrb[8].mxu1 %v277_v27  ;;  %v279_v36 = vmul.f32 %v263_v0, %v215_v31 }
 0x11e   :  { %v779_v32 = vpop.eup %778  ;;  %v278_v33 = vmul.f32 %v262_v30, %v214_v28 }
 0x11f   :  { %v781_v34 = vpop.eup %780  ;;  %v265_v35 = vadd.f32 1.0, %v779_v32 }
 0x120   :  { %v264_v29 = vadd.f32 1.0, %v781_v34  ;;  %681 = vmatprep.mubr.f32.mxu1 %v278_v33 }
 0x121   :  { %682 = vmatmul.mubr.f32.gmra.mrb[10].mxu1 %v279_v36  ;;  %v281_v43 = vmul.f32 %v265_v35, %v217_v38 }
 0x122   :  { %v783_v39 = vpop.eup %782  ;;  %v280_v40 = vmul.f32 %v264_v29, %v216_v37 }
 0x123   :  { %v785_v41 = vpop.eup %784  ;;  %v267_v42 = vadd.f32 1.0, %v783_v39 }
 0x124   :  { %v266_v46 = vadd.f32 1.0, %v785_v41  ;;  %684 = vmatprep.mubr.f32.mxu1 %v280_v40 }
 0x125   :  { %685 = vmatmul.mubr.f32.gmra.mrb[12].mxu1 %v281_v43  ;;  %v283_v48 = vmul.f32 %v267_v42, %v219_v45 }
 0x126   :  { %v282_v47 = vmul.f32 %v266_v46, %v218_v44 }
 0x128   :  { %687 = vmatprep.mubr.f32.mxu1 %v282_v47 }
 0x129   :  { %688 = vmatmul.mubr.f32.gmra.mrb[14].mxu1 %v283_v48 }
 0x1e0   :  { %v668_v50 = vpop.f32.mrb[0].mxu1 }
 0x1e1   :  { %v379_v51 = vadd.f32 %v668_v50, %v513_v49  ;;  %v373_v52 = vpop.f32.mrb[1].mxu1 }
 0x1e2   :  { %v374_v53 = vadd.f32 %v513_v49, %v373_v52 }
 0x1e3   :  { %502 = vst [vmem:[%s1007_s5 + $0x8] sm:$0xff] %v379_v51 }
 0x1e4   :  { %500 = vst [vmem:[%s1007_s5] sm:$0xff] %v374_v53  ;;  %v671_v54 = vpop.f32.mrb[2].mxu1 }
 0x1e5   :  { %v383_v55 = vpop.f32.mrb[3].mxu1 }
 0x1e8   :  { %v674_v56 = vpop.f32.mrb[4].mxu1 }
 0x1e9   :  { %v393_v57 = vpop.f32.mrb[5].mxu1 }
 0x1ec   :  { %v677_v58 = vpop.f32.mrb[6].mxu1 }
 0x1ed   :  { %v403_v59 = vpop.f32.mrb[7].mxu1 }
 0x1f0   :  { %v680_v60 = vpop.f32.mrb[8].mxu1 }
 0x1f1   :  { %v413_v61 = vpop.f32.mrb[9].mxu1 }
 0x1f4   :  { %v683_v62 = vpop.f32.mrb[10].mxu1 }
 0x1f5   :  { %v423_v63 = vpop.f32.mrb[11].mxu1 }
 0x1f8   :  { %v686_v1 = vpop.f32.mrb[12].mxu1 }
 0x1f9   :  { %v433_v2 = vpop.f32.mrb[13].mxu1 }
 0x1fc   :  { %v689_v3 = vpop.f32.mrb[14].mxu1 }
 0x1fd   :  { %v443_v4 = vpop.f32.mrb[15].mxu1 }

</bundles_post_ra>
